<compile_context>
chip_gen: v6e
topology: v6e:2x2x1
jax: 0.10.0
libtpu: 0.0.40
codegen_flags: <defaults>
</compile_context>

<pallas_src>
import functools
import math

import jax
import jax.numpy as jnp
from jax import lax
from jax.experimental import pallas as pl
from jax.experimental.pallas import tpu as pltpu


# ----------------------------------------------------------------------------
# In-kernel helpers
# ----------------------------------------------------------------------------
def _layer_norm(x, gamma, beta, eps=1e-5):
    mu = jnp.mean(x, axis=-1, keepdims=True)
    xc = x - mu
    var = jnp.mean(xc * xc, axis=-1, keepdims=True)
    return xc * lax.rsqrt(var + eps) * gamma + beta


# ----------------------------------------------------------------------------
# Fused MoE kernel: one (batch, expert) pair per program.
#   grid = (B, E); E is the (innermost) reduction axis -> output block is
#   resident across it and accumulates  sum_e w[b,e] * expert_e(x[b]).
# ----------------------------------------------------------------------------
def moe_kernel(w_ref,                                   # SMEM [B, E] routing weights
               x_ref,                                   # VMEM [S, D]
               wq_ref, bq_ref, wk_ref, bk_ref, wv_ref, bv_ref,
               wo_ref, bo_ref,
               w1_ref, b1_ref, w2_ref, b2_ref,
               g1_ref, be1_ref, g2_ref, be2_ref,
               gf_ref, bf_ref, wp_ref, bp_ref,
               o_ref,                                   # VMEM [S, D] accumulator
               ctx_ref,                                 # VMEM scratch [S, D]
               *, n_layers, n_heads, head_dim, activation):
    b = pl.program_id(0)
    e = pl.program_id(1)
    scale = 1.0 / math.sqrt(head_dim)                   # DSAttention scale (tau=1, delta=0)

    x = x_ref[...].astype(jnp.float32)                  # [S, D]

    for l in range(n_layers):
        # ---- packed multi-head DSAttention projections (heads along lanes)
        q = jnp.dot(x, wq_ref[l], preferred_element_type=jnp.float32) + bq_ref[l]
        k = jnp.dot(x, wk_ref[l], preferred_element_type=jnp.float32) + bk_ref[l]
        v = jnp.dot(x, wv_ref[l], preferred_element_type=jnp.float32) + bv_ref[l]

        # per-head scaled-dot-product attention on static lane slices
        for h in range(n_heads):
            lo = h * head_dim
            hi = lo + head_dim
            qh = q[:, lo:hi]
            kh = k[:, lo:hi]
            vh = v[:, lo:hi]
            s = lax.dot_general(qh, kh, (((1,), (1,)), ((), ())),
                                preferred_element_type=jnp.float32) * scale    # [S, S]
            s = s - jnp.max(s, axis=-1, keepdims=True)
            p = jnp.exp(s)
            p = p * pl.reciprocal(jnp.sum(p, axis=-1, keepdims=True), approx=False)
            ctx_ref[:, lo:hi] = jnp.dot(p, vh, preferred_element_type=jnp.float32)

        # concat-heads output projection: single [S, D] @ [D, D] matmul
        attn = jnp.dot(ctx_ref[...], wo_ref[l],
                       preferred_element_type=jnp.float32) + bo_ref[l]

        # ---- residual + norm1
        x = _layer_norm(x + attn, g1_ref[l], be1_ref[l])

        # ---- FFN (conv1d k=1 == per-position matmul); dropout == identity
        y = jnp.dot(x, w1_ref[l], preferred_element_type=jnp.float32) + b1_ref[l]
        if activation == "relu":
            y = jnp.maximum(y, 0.0)
        else:
            # TODO(synk): PyTorch F.gelu default is exact erf; tanh approx used here.
            y = jax.nn.gelu(y, approximate=True)
        y = jnp.dot(y, w2_ref[l], preferred_element_type=jnp.float32) + b2_ref[l]

        # ---- residual + norm2
        x = _layer_norm(x + y, g2_ref[l], be2_ref[l])

    # ---- final encoder LayerNorm + expert projection Linear
    x = _layer_norm(x, gf_ref[...], bf_ref[...])
    out = jnp.dot(x, wp_ref[...], preferred_element_type=jnp.float32) + bp_ref[...]

    # ---- fused weighted combine into the resident output block
    contrib = (w_ref[b, e] * out).astype(o_ref.dtype)

    @pl.when(e == 0)
    def _():
        o_ref[...] = jnp.zeros_like(o_ref)

    o_ref[...] += contrib


def run_moe(x, full_w, sp, *, n_heads, activation):
    """x: [B, S, D]; full_w: [B, E] routing weights; sp: expert params stacked on axis 0."""
    B, S, D = x.shape
    Ex = sp["wq"].shape[0]
    L = sp["wq"].shape[1]
    head_dim = D // n_heads

    weight_keys = ("wq", "bq", "wk", "bk", "wv", "bv", "wo", "bo",
                   "w1", "b1", "w2", "b2",
                   "g1", "be1", "g2", "be2",
                   "gf", "bf", "wp", "bp")
    weight_args = [sp[k] for k in weight_keys]

    def w_spec(a):
        # Leading expert axis is squeezed; the rest of the array is the block.
        return pl.BlockSpec((pl.Squeezed(),) + a.shape[1:],
                            lambda b, e, _n=a.ndim: (e,) + (0,) * (_n - 1))

    kernel = functools.partial(moe_kernel, n_layers=L, n_heads=n_heads,
                               head_dim=head_dim, activation=activation)

    return pl.pallas_call(
        kernel,
        out_shape=jax.ShapeDtypeStruct((B, S, D), x.dtype),
        grid=(B, Ex),
        in_specs=[pl.BlockSpec(memory_space=pltpu.MemorySpace.SMEM)]       # routing weights
                 + [pl.BlockSpec((pl.Squeezed(), S, D), lambda b, e: (b, 0, 0))]
                 + [w_spec(a) for a in weight_args],
        out_specs=pl.BlockSpec((pl.Squeezed(), S, D), lambda b, e: (b, 0, 0)),
        scratch_shapes=[pltpu.VMEM((S, D), jnp.float32)],
        compiler_params=pltpu.CompilerParams(
            dimension_semantics=("parallel", "arbitrary"),
            vmem_limit_bytes=32 * 1024 * 1024),
    )(full_w, x, *weight_args)


# ----------------------------------------------------------------------------
# Router kernel: Linear -> ReLU -> (Dropout=identity) -> Linear -> Softmax
# ----------------------------------------------------------------------------
def router_kernel(cov_ref, w1_ref, b1_ref, w2_ref, b2_ref, o_ref):
    h = jnp.dot(cov_ref[...], w1_ref[...], preferred_element_type=jnp.float32) + b1_ref[...]
    h = jnp.maximum(h, 0.0)
    z = jnp.dot(h, w2_ref[...], preferred_element_type=jnp.float32) + b2_ref[...]
    z = z - jnp.max(z, axis=-1, keepdims=True)
    ez = jnp.exp(z)
    o_ref[...] = ez * pl.reciprocal(jnp.sum(ez, axis=-1, keepdims=True), approx=False)


def run_router(cov, rp):
    B = cov.shape[0]
    n_spec = rp["w2"].shape[-1]
    vmem = pl.BlockSpec(memory_space=pltpu.MemorySpace.VMEM)
    return pl.pallas_call(
        router_kernel,
        out_shape=jax.ShapeDtypeStruct((B, n_spec), jnp.float32),
        in_specs=[vmem] * 5,
        out_specs=pl.BlockSpec(memory_space=pltpu.MemorySpace.VMEM),
    )(cov, rp["w1"], rp["b1"], rp["w2"], rp["b2"])


# ----------------------------------------------------------------------------
# MixtureOfExperts forward (glue in plain JAX; heavy math in the fused kernel)
# ----------------------------------------------------------------------------
def mixture_of_experts_forward(x, cov_embedding, params, cfg):
    B, S, D = x.shape
    num_experts = cfg["num_experts"]
    num_universal = cfg["num_universal_experts"]
    num_spec = num_experts - num_universal
    uw_total = cfg["universal_expert_weight"]

    if num_universal > 0:
        uw = uw_total / num_universal
        universal_cols = jnp.full((B, num_universal), uw, jnp.float32)
    else:
        universal_cols = jnp.zeros((B, 0), jnp.float32)

    if num_spec > 0:
        spec_w = run_router(cov_embedding, params["router"])              # [B, n_spec]
        # TODO(synk): sparse top-k gating (use_sparse_gating=True) not implemented (default False)
        spec_w = spec_w * (1.0 - uw_total)
        usage = jnp.mean(spec_w, axis=0)        # == routing_weights.T.mean(dim=1)
        load_loss = jnp.mean((usage - 1.0 / num_spec) ** 2)
    else:
        spec_w = jnp.zeros((B, 0), jnp.float32)
        load_loss = jnp.float32(0.0)

    full_w = jnp.concatenate([universal_cols, spec_w], axis=1)            # [B, num_experts]

    mixed = run_moe(x, full_w, params["experts_stacked"],
                    n_heads=cfg["n_heads"], activation=cfg["activation"])
    return mixed, load_loss, full_w


# ----------------------------------------------------------------------------
# Deterministic parameter construction (shapes from the module's __init__).
# Heads are packed along the output columns: head h occupies cols [h*E, (h+1)*E),
# matching nn.MultiheadAttention / AttentionLayer head slicing.
# ----------------------------------------------------------------------------
def init_expert_params(key, L, D, n_heads, d_ff):
    ks = jax.random.split(key, 14)
    s = 0.05

    def nrm(k, shape, scale=s):
        return jax.random.normal(k, shape, jnp.float32) * scale

    return {
        # attention projections, heads packed along lanes, x @ W orientation
        "wq": nrm(ks[0], (L, D, D)), "bq": nrm(ks[1], (L, 1, D), 0.01),
        "wk": nrm(ks[2], (L, D, D)), "bk": nrm(ks[3], (L, 1, D), 0.01),
        "wv": nrm(ks[4], (L, D, D)), "bv": nrm(ks[5], (L, 1, D), 0.01),
        "wo": nrm(ks[6], (L, D, D)), "bo": nrm(ks[7], (L, 1, D), 0.01),
        # FFN (Conv1d kernel_size=1 as matmuls)
        "w1": nrm(ks[8], (L, D, d_ff)),  "b1": nrm(ks[9], (L, 1, d_ff), 0.01),
        "w2": nrm(ks[10], (L, d_ff, D)), "b2": nrm(ks[11], (L, 1, D), 0.01),
        # layer norms
        "g1": jnp.ones((L, 1, D), jnp.float32), "be1": jnp.zeros((L, 1, D), jnp.float32),
        "g2": jnp.ones((L, 1, D), jnp.float32), "be2": jnp.zeros((L, 1, D), jnp.float32),
        "gf": jnp.ones((1, D), jnp.float32),    "bf": jnp.zeros((1, D), jnp.float32),
        # expert output projection
        "wp": nrm(ks[12], (D, D)), "bp": nrm(ks[13], (1, D), 0.01),
    }


def stack_expert_params(expert_param_list):
    return {k: jnp.stack([p[k] for p in expert_param_list], axis=0)
            for k in expert_param_list[0]}


def init_router_params(key, D, n_spec):
    ks = jax.random.split(key, 4)
    return {
        "w1": jax.random.normal(ks[0], (D, D // 2), jnp.float32) * 0.05,
        "b1": jax.random.normal(ks[1], (1, D // 2), jnp.float32) * 0.01,
        "w2": jax.random.normal(ks[2], (D // 2, n_spec), jnp.float32) * 0.05,
        "b2": jax.random.normal(ks[3], (1, n_spec), jnp.float32) * 0.01,
    }


if __name__ == "__main__":
    cfg = dict(d_model=32, n_heads=4, d_ff=64, expert_layers=2,
               activation="relu",
               num_experts=4, num_universal_experts=1,
               universal_expert_weight=0.3)

    B, S, D = 2, 8, cfg["d_model"]
    num_spec = cfg["num_experts"] - cfg["num_universal_experts"]

    key = jax.random.PRNGKey(0)
    k_x, k_cov, k_p = jax.random.split(key, 3)
    x = jax.random.normal(k_x, (B, S, D), jnp.float32)
    cov = jax.random.normal(k_cov, (B, D), jnp.float32)

    ek = jax.random.split(k_p, cfg["num_experts"] + 1)
    expert_list = [init_expert_params(ek[e], cfg["expert_layers"], D,
                                      cfg["n_heads"], cfg["d_ff"])
                   for e in range(cfg["num_experts"])]
    params = {
        "experts_stacked": stack_expert_params(expert_list),
        "router": init_router_params(ek[-1], D, num_spec),
    }

    mixed, load_loss, routing_w = mixture_of_experts_forward(x, cov, params, cfg)
    jax.block_until_ready((mixed, load_loss, routing_w))

    assert mixed.shape == (B, S, D)
    assert routing_w.shape == (B, cfg["num_experts"])
    assert load_loss.shape == ()
    assert bool(jnp.all(jnp.isfinite(mixed)))
    print("KERNEL_OK")
</pallas_src>

<mosaic_0001>
module attributes {stable_mosaic.version = 11 : i64} {
  func.func @router_kernel(%arg0: memref<2x32xf32, #tpu.memory_space<vmem>>, %arg1: memref<32x16xf32, #tpu.memory_space<vmem>>, %arg2: memref<1x16xf32, #tpu.memory_space<vmem>>, %arg3: memref<16x3xf32, #tpu.memory_space<vmem>>, %arg4: memref<1x3xf32, #tpu.memory_space<vmem>>, %arg5: memref<2x3xf32, #tpu.memory_space<vmem>>) attributes {dimension_semantics = [], scalar_prefetch = 0 : i64, scratch_operands = 0 : i64, tpu.core_type = #tpu.core_type<tc>} {
    %c0 = arith.constant 0 : index
    %c0_0 = arith.constant 0 : index
    %0 = vector.load %arg0[%c0, %c0_0] : memref<2x32xf32, #tpu.memory_space<vmem>>, vector<2x32xf32>
    %c0_1 = arith.constant 0 : index
    %c0_2 = arith.constant 0 : index
    %1 = vector.load %arg1[%c0_1, %c0_2] : memref<32x16xf32, #tpu.memory_space<vmem>>, vector<32x16xf32>
    %cst = arith.constant dense<0.000000e+00> : vector<2x16xf32>
    %2 = tpu.matmul %0, %1, %cst {dimension_numbers = #tpu.dot_dimension_numbers<[1], [0], [0], [1], [0, 0, 1, 1], [], []>} : vector<2x32xf32>, vector<32x16xf32>, vector<2x16xf32> -> vector<2x16xf32>
    %c0_3 = arith.constant 0 : index
    %c0_4 = arith.constant 0 : index
    %3 = vector.load %arg2[%c0_3, %c0_4] : memref<1x16xf32, #tpu.memory_space<vmem>>, vector<1x16xf32>
    %4 = vector.broadcast %3 : vector<1x16xf32> to vector<2x16xf32>
    %5 = arith.addf %2, %4 : vector<2x16xf32>
    %cst_5 = arith.constant 0.000000e+00 : f32
    %6 = vector.broadcast %cst_5 : f32 to vector<2x16xf32>
    %7 = arith.maximumf %5, %6 : vector<2x16xf32>
    %c0_6 = arith.constant 0 : index
    %c0_7 = arith.constant 0 : index
    %8 = vector.load %arg3[%c0_6, %c0_7] : memref<16x3xf32, #tpu.memory_space<vmem>>, vector<16x3xf32>
    %cst_8 = arith.constant dense<0.000000e+00> : vector<2x3xf32>
    %9 = tpu.matmul %7, %8, %cst_8 {dimension_numbers = #tpu.dot_dimension_numbers<[1], [0], [0], [1], [0, 0, 1, 1], [], []>} : vector<2x16xf32>, vector<16x3xf32>, vector<2x3xf32> -> vector<2x3xf32>
    %c0_9 = arith.constant 0 : index
    %c0_10 = arith.constant 0 : index
    %10 = vector.load %arg4[%c0_9, %c0_10] : memref<1x3xf32, #tpu.memory_space<vmem>>, vector<1x3xf32>
    %11 = vector.broadcast %10 : vector<1x3xf32> to vector<2x3xf32>
    %12 = arith.addf %9, %11 : vector<2x3xf32>
    %cst_11 = arith.constant dense<0xFF800000> : vector<2xf32>
    %13 = vector.multi_reduction <maximumf>, %12, %cst_11 [1] : vector<2x3xf32> to vector<2xf32>
    %14 = vector.shape_cast %13 : vector<2xf32> to vector<2x1xf32>
    %15 = vector.broadcast %14 : vector<2x1xf32> to vector<2x3xf32>
    %16 = arith.subf %12, %15 : vector<2x3xf32>
    %17 = math.exp %16 : vector<2x3xf32>
    %cst_12 = arith.constant dense<0.000000e+00> : vector<2xf32>
    %18 = vector.multi_reduction <add>, %17, %cst_12 [1] : vector<2x3xf32> to vector<2xf32>
    %19 = vector.shape_cast %18 : vector<2xf32> to vector<2x1xf32>
    %20 = tpu.reciprocal %19 : vector<2x1xf32> -> vector<2x1xf32>
    %21 = vector.broadcast %20 : vector<2x1xf32> to vector<2x3xf32>
    %22 = arith.mulf %17, %21 : vector<2x3xf32>
    %c0_13 = arith.constant 0 : index
    %c0_14 = arith.constant 0 : index
    %23 = vector.load %arg5[%c0_13, %c0_14] : memref<2x3xf32, #tpu.memory_space<vmem>>, vector<2x3xf32>
    tpu.vector_store %arg5[%c0_13, %c0_14], %22 {strides = array<i32>} : memref<2x3xf32, #tpu.memory_space<vmem>>, vector<2x3xf32>,
    return
  }
}

</mosaic_0001>

<bundles_post_ra>
// kernel: tpu_custom_call.1
= control target key start
LH: loop header
LB: loop body
LE: loop exit
PB: predicated region body
PF: predicated region fallthrough
CT: control target
= control target key end

     0   :  { %v277_v1 = vmov 0.0   ;;  %vm278_vm0 = vmmov 0   ;;  %s343_s0 = inlined_call_operand.vmem [shape: f32[2,32], index: 0, kind: input, shape index: {}]   ;;  %s344_s1 = inlined_call_operand.vmem [shape: f32[32,16], index: 1, kind: input, shape index: {}]   ;;  %s345_s2 = inlined_call_operand.vmem [shape: f32[1,16], index: 2, kind: input, shape index: {}]   ;;  %s346_s3 = inlined_call_operand.vmem [shape: f32[16,3], index: 3, kind: input, shape index: {}]   ;;  %s347_s4 = inlined_call_operand.vmem [shape: f32[1,3], index: 4, kind: input, shape index: {}]   ;;  %s348_s5 = inlined_call_operand.hbm [shape: f32[2,3], index: 5, kind: output, shape index: {}]  }
   0x1   :  { %v25_v0 = vld [vmem:[%s344_s1 + $0x18] sm:$0xff]  ;;  %230 = vmatprep.subr.mxu0 %v277_v1  ;;  %v24_v2 = vld [vmem:[%s344_s1 + $0x10] sm:$0xff]  ;;  %238 = vmatprep.mubr.msk.f32.mxu0 %vm278_vm0, %v277_v1 }
   0x2   :  { %231 = vmatpush3.msra.mxu0 %v25_v0  ;;  %241 = vmatprep.subr.mxu1 %v277_v1 }
   0x3   :  { %10 = vsyncpa [#allocation3], 0  ;;  %232 = vmatprep.subr.mxu0 %v277_v1  ;;  %v23_v3 = vld [vmem:[%s344_s1 + $0x8] sm:$0xff]  ;;  %245 = vmatprep.mubr.msk.f32.mxu1 %vm278_vm0, %v277_v1  ;;  %v22_v4 = vld [vmem:[%s344_s1] sm:$0xff]  ;;  %vm33_vm1 = vcmask 261120   ;;  %vm117_vm2 = vcmask 130048  }
   0x4   :  { %233 = vmatpush3.msra.mxu0 %v24_v2  ;;  %v21_v5 = vld [vmem:[%s343_s0] sm:$0x3]  ;;  %v109_v6 = vld [vmem:[%s346_s3 + $0x8] sm:$0xff]  ;;  %vm191_vm3 = vcmask 17408  }
   0x5   :  { %234 = vmatprep.subr.mxu0 %v277_v1  ;;  %242 = vmatpush3.msra.mxu1 %v109_v6  ;;  %v108_v7 = vld [vmem:[%s346_s3] sm:$0xff] }
   0x6   :  { %235 = vmatpush3.msra.mxu0 %v23_v3  ;;  %243 = vmatprep.subr.mxu1 %v277_v1  ;;  %v218_v8 = vld [vmem:[%s345_s2] ss:$0 sm:$0xff]  ;;  %s279_s2 = smov [#allocation2]  }
   0x7   :  { %236 = vmatprep.subr.mxu0 %v277_v1  ;;  %244 = vmatpush3.msra.mxu1 %v108_v7  ;;  %v220_v13 = vld [vmem:[%s347_s4] ss:$0 sm:$0xff]  ;;  %s210_s3 = sshll.u32 %s279_s2, 4  ;;  %s211_s3 = int_to_ptr.vmem [resolvable:$true] %s210_s3 }
   0x8   :  { %237 = vmatpush3.msra.mxu0 %v22_v4  ;;  %s255_s4 = scalar_lea.vmem %s211_s3, 32  ;;  %p260_p1 = scmp.lt.s32.totalorder %s211_s3, %s211_s3 }
   0x9   :  { %239 = vmatmul.mubr.msk.f32.vlgmr.msra.gmra.mxu0 %vm33_vm1, %v21_v5  ;;  %p256_p0 = scmp.ne.s32.totalorder %s211_s3, %s255_s4  ;;  %p261_p2 = scmp.lt.s32.totalorder %s255_s4, %s255_s4 }
   0xb   :  { %p262_p3 = por %p261_p2, %p260_p1 }
   0xd   :  { %p263_p4 = pnand %p262_p3, %p256_p0 }
  0xc9   :  { %v103_v9 = vpop.f32.mrf.mxu0 }
  0xca   :  { %v104_v10 = vadd.f32 %v218_v8, %v103_v9 }
  0xcb   :  { %v240_v11 = vpop.f32.mrf.mxu0 }
  0xcc   :  { %v107_v12 = vmax.f32 %v104_v10, 0.0 }
  0xce   :  { %246 = vmatmul.mubr.msk.f32.vlgmr.msra.gmra.mxu1 %vm117_vm2, %v107_v12 }
 0x18e   :  { %v187_v14 = vpop.f32.mrf.mxu1 }
 0x18f   :  { %v188_v15 = vadd.f32 %v220_v13, %v187_v14 }
 0x190   :  { %v247_v16 = vpop.f32.mrf.mxu1 }
 0x191   :  { %v192_v17 = vsel %vm191_vm3, %v188_v15, -inf }
 0x192   :  { %193 = vmax.xlane.f32.xlu0 %v192_v17 }
 0x21b   :  { %v194_v18 = vpop.xlane.xlu0 %193 }
 0x21c   :  { %v195_v19 = vsub.f32 %v188_v15, %v194_v18 }
 0x21e   :  { %v196_v20 = vmul.f32 1.442695, %v195_v19 }
 0x220   :  { %251 = vpow2.f32 %v196_v20 }
 0x22d   :  { %v252_v21 = vpop.eup %251 }
 0x22e   :  { %v198_v22 = vsel %vm191_vm3, %v252_v21, 0.0 }
 0x22f   :  { %199 = vadd.xlane.f32.xlu0 %v198_v22 }
 0x2b8   :  { %v200_v23 = vpop.xlane.xlu0 %199 }
 0x2b9   :  { %253 = vrcp.f32 %v200_v23 }
 0x2c6   :  { %v254_v24 = vpop.eup %253 }
 0x2c7   :  { %v202_v25 = vmul.f32 %v254_v24, %v252_v21 }
 0x2c9   :  { %203 = vst.msk [vmem:[#allocation2] sm:$0x3] %vm191_vm3, %v202_v25 }
 0x2ca   :  { %266 = shalt.err (!%p263_p4)
}
 0x2cb   :  { %213 = dma.vmem_to_hbm [thread:$0]  %s211_s3, 32, %s348_s5, [#allocation3]  }
 0x2cc   :  { %275 = dma.done.wait [#allocation3], 32  }
 0x2cd   :  { %276 = vsyncadd [#allocation3], 4294967264 }
 0x2ce   :  { %217 = vsyncpa [#allocation3], 1 }

</bundles_post_ra>
